<compile_context>
chip_gen: v5e
topology: v5e:2x2
jax: 0.10.0
libtpu: 0.0.40
codegen_flags: <defaults>
</compile_context>

<pallas_src>
import functools

import jax
import jax.numpy as jnp
import numpy as np
from jax import lax
from jax.experimental import pallas as pl
from jax.experimental.pallas import tpu as pltpu

_EPS = 1e-5


def _roll_last(x, shift):
    """Circular roll along the last (lane) axis; XLU vrot when lane-aligned."""
    size = x.shape[-1]
    shift = shift % size
    if shift == 0:
        return x
    if size % 128 == 0:
        return pltpu.roll(x, shift, x.ndim - 1)
    # Fallback for non-lane-aligned widths.
    return jnp.roll(x, shift, axis=-1)


def _lt_modeler_kernel(x_ref, gamma_ref, beta_ref, o_ref, *, W):
    x = x_ref[...].astype(jnp.float32)                     # (N, CB, H*W)
    N, CB, HW = x.shape

    # --- PixelMixer as circular shifts on the flattened (H*W) lane axis ----
    # H-shifts are exact flat rolls by +-W.
    s_up = _roll_last(x, -W)                               # x[h+1, w]
    s_down = _roll_last(x, W)                              # x[h-1, w]
    # W-shifts: flat roll by +-1 everywhere, fix the row-wrap column.
    col = lax.broadcasted_iota(jnp.int32, (1, 1, HW), 2) % W
    last_col = col == (W - 1)
    first_col = col == 0
    s_left = jnp.where(last_col, _roll_last(x, W - 1), _roll_last(x, -1))
    s_right = jnp.where(first_col, _roll_last(x, -(W - 1)), _roll_last(x, 1))

    # Static one-hot per-channel mode weights (block start is a multiple of 5,
    # so mode == local_channel % 5 is compile-time static inside the block).
    mode = lax.broadcasted_iota(jnp.int32, (1, CB, 1), 1) % 5
    w0 = (mode == 0).astype(jnp.float32)
    w1 = (mode == 1).astype(jnp.float32)
    w2 = (mode == 2).astype(jnp.float32)
    w3 = (mode == 3).astype(jnp.float32)
    w4 = (mode == 4).astype(jnp.float32)
    mixed = w0 * s_left + w1 * s_right + w2 * s_up + w3 * s_down + w4 * x

    d = mixed - x

    # --- BatchNorm2d (training-mode forward), single-pass per-channel stats -
    cnt = float(N * HW)
    s1 = jnp.sum(jnp.sum(d, axis=2, keepdims=True), axis=0, keepdims=True)
    s2 = jnp.sum(jnp.sum(d * d, axis=2, keepdims=True), axis=0, keepdims=True)
    mean = s1 * (1.0 / cnt)                                # (1, CB, 1)
    var = jnp.maximum(s2 * (1.0 / cnt) - mean * mean, 0.0)
    inv = lax.rsqrt(var + _EPS)

    gamma = gamma_ref[...].astype(jnp.float32)             # (1, CB, 1)
    beta = beta_ref[...].astype(jnp.float32)
    o_ref[...] = ((d - mean) * (inv * gamma) + beta).astype(o_ref.dtype)


def _pick_block_c(C, N, HW, itemsize, budget_bytes=1 << 20):
    """Pick the channel-block size CB.

    CB must divide C, be a multiple of 5 (so the mode pattern is static per
    block), and be a multiple of 8 or equal to C (tile-legal sublane block
    dim). Prefer the largest CB under the VMEM budget, and keep >=2 grid steps
    when possible so both v7x TensorCores share the HBM-bound loop.
    """
    per_ch = N * HW * itemsize
    cands = [cb for cb in range(40, C, 40) if C % cb == 0] + [C]
    fit = [cb for cb in cands if cb * per_ch <= budget_bytes]
    if not fit:
        # TODO(synk): for very large N*H*W also tile the spatial axis and
        # accumulate BN sum/sumsq in VMEM scratch across those grid steps.
        return min(cands)
    cb = max(fit)
    if cb == C:
        smaller = [c for c in fit if c < C]
        if smaller:
            cb = max(smaller)
    return cb


def lt_modeler(x, gamma, beta):
    """x: (N, C, H, W); gamma/beta: (C,). Returns BatchNorm2d(PixelMixer(x)-x)."""
    N, C, H, W = x.shape
    assert C % 5 == 0, "PixelMixer requires planes % 5 == 0"
    HW = H * W
    CB = _pick_block_c(C, N, HW, jnp.dtype(x.dtype).itemsize)
    assert C % CB == 0 and CB % 5 == 0

    x3 = x.reshape(N, C, HW)          # free reshape -> lane-dense last dim
    g3 = gamma.reshape(1, C, 1)
    b3 = beta.reshape(1, C, 1)

    data_spec = pl.BlockSpec((N, CB, HW), lambda i: (0, i, 0))
    param_spec = pl.BlockSpec((1, CB, 1), lambda i: (0, i, 0))

    out = pl.pallas_call(
        functools.partial(_lt_modeler_kernel, W=W),
        out_shape=jax.ShapeDtypeStruct((N, C, HW), x.dtype),
        grid=(C // CB,),
        in_specs=[data_spec, param_spec, param_spec],
        out_specs=data_spec,
        compiler_params=pltpu.CompilerParams(
            dimension_semantics=("parallel",),
            vmem_limit_bytes=32 * 1024 * 1024,
        ),
    )(x3, g3, b3)
    return out.reshape(N, C, H, W)


def _ref_lt_modeler(x, gamma, beta):
    """Pure-JAX reference for correctness checking."""
    N, C, H, W = x.shape
    mode = (jnp.arange(C) % 5)[None, :, None, None]
    s_left = jnp.roll(x, -1, axis=3)
    s_right = jnp.roll(x, 1, axis=3)
    s_up = jnp.roll(x, -1, axis=2)
    s_down = jnp.roll(x, 1, axis=2)
    mixed = jnp.where(mode == 0, s_left,
            jnp.where(mode == 1, s_right,
            jnp.where(mode == 2, s_up,
            jnp.where(mode == 3, s_down, x))))
    d = mixed - x
    mean = jnp.mean(d, axis=(0, 2, 3), keepdims=True)
    var = jnp.mean((d - mean) ** 2, axis=(0, 2, 3), keepdims=True)
    y = (d - mean) / jnp.sqrt(var + _EPS)
    return y * gamma[None, :, None, None] + beta[None, :, None, None]


if __name__ == "__main__":
    key = jax.random.PRNGKey(0)
    N, C, H, W = 2, 10, 16, 16        # dim (=C) must be a multiple of 5
    x = jax.random.normal(key, (N, C, H, W), dtype=jnp.float32)
    # nn.BatchNorm2d default parameter init: weight=1, bias=0.
    gamma = jnp.ones((C,), jnp.float32)
    beta = jnp.zeros((C,), jnp.float32)
    # TODO(synk): BatchNorm2d running-stat updates (training-mode side effect)
    # are not materialized; only the forward output is computed.

    out = lt_modeler(x, gamma, beta)
    jax.block_until_ready(out)

    ref = _ref_lt_modeler(x, gamma, beta)
    assert np.allclose(np.asarray(out), np.asarray(ref), atol=1e-4, rtol=1e-4)
    print("KERNEL_OK")
</pallas_src>

<mosaic_0001>
module attributes {stable_mosaic.version = 11 : i64} {
  func.func @_lt_modeler_kernel(%arg0: i32, %arg1: memref<2x10x256xf32, #tpu.memory_space<vmem>>, %arg2: memref<1x10x1xf32, #tpu.memory_space<vmem>>, %arg3: memref<1x10x1xf32, #tpu.memory_space<vmem>>, %arg4: memref<2x10x256xf32, #tpu.memory_space<vmem>>) attributes {dimension_semantics = [#tpu.dimension_semantics<parallel>], iteration_bounds = array<i64: 1>, scalar_prefetch = 0 : i64, scratch_operands = 0 : i64, tpu.core_type = #tpu.core_type<tc>, window_params = [{transform_indices = @transform_0, window_bounds = array<i64: 2, 10, 256>}, {transform_indices = @transform_1, window_bounds = array<i64: 1, 10, 1>}, {transform_indices = @transform_2, window_bounds = array<i64: 1, 10, 1>}, {transform_indices = @transform_3, window_bounds = array<i64: 2, 10, 256>}]} {
    %c0 = arith.constant 0 : index
    %c0_0 = arith.constant 0 : index
    %c0_1 = arith.constant 0 : index
    %0 = vector.load %arg1[%c0, %c0_0, %c0_1] : memref<2x10x256xf32, #tpu.memory_space<vmem>>, vector<2x10x256xf32>
    %c240_i32 = arith.constant 240 : i32
    %1 = tpu.dynamic_rotate %0 by %c240_i32 dim 2 : vector<2x10x256xf32>, i32 -> vector<2x10x256xf32>
    %c16_i32 = arith.constant 16 : i32
    %2 = tpu.dynamic_rotate %0 by %c16_i32 dim 2 : vector<2x10x256xf32>, i32 -> vector<2x10x256xf32>
    %3 = tpu.iota {dimensions = array<i32: 2>} : vector<1x1x256xi32>
    %c16_i32_2 = arith.constant 16 : i32
    %c0_i32 = arith.constant 0 : i32
    %4 = arith.cmpi eq, %c16_i32_2, %c0_i32 : i32
    %c1_i32 = arith.constant 1 : i32
    %5 = arith.select %4, %c1_i32, %c16_i32_2 : i32
    %6 = vector.broadcast %5 : i32 to vector<1x1x256xi32>
    %7 = arith.remsi %3, %6 : vector<1x1x256xi32>
    %c0_i32_3 = arith.constant 0 : i32
    %8 = vector.broadcast %c0_i32_3 : i32 to vector<1x1x256xi32>
    %9 = arith.cmpi ne, %7, %8 : vector<1x1x256xi32>
    %c0_i32_4 = arith.constant 0 : i32
    %10 = vector.broadcast %c0_i32_4 : i32 to vector<1x1x256xi32>
    %11 = arith.cmpi slt, %7, %10 : vector<1x1x256xi32>
    %c0_i32_5 = arith.constant 0 : i32
    %12 = arith.cmpi slt, %5, %c0_i32_5 : i32
    %13 = vector.broadcast %12 : i1 to vector<1x1x256xi1>
    %14 = vector.broadcast %13 : vector<1x1x256xi1> to vector<1x1x256xi1>
    %15 = arith.xori %11, %14 : vector<1x1x256xi1>
    %16 = arith.andi %15, %9 : vector<1x1x256xi1>
    %17 = vector.broadcast %5 : i32 to vector<1x1x256xi32>
    %18 = arith.addi %7, %17 : vector<1x1x256xi32>
    %19 = arith.select %16, %18, %7 : vector<1x1x256xi1>, vector<1x1x256xi32>
    %c15_i32 = arith.constant 15 : i32
    %20 = vector.broadcast %c15_i32 : i32 to vector<1x1x256xi32>
    %21 = arith.cmpi eq, %19, %20 : vector<1x1x256xi32>
    %c0_i32_6 = arith.constant 0 : i32
    %22 = vector.broadcast %c0_i32_6 : i32 to vector<1x1x256xi32>
    %23 = arith.cmpi eq, %19, %22 : vector<1x1x256xi32>
    %c15_i32_7 = arith.constant 15 : i32
    %24 = tpu.dynamic_rotate %0 by %c15_i32_7 dim 2 : vector<2x10x256xf32>, i32 -> vector<2x10x256xf32>
    %c255_i32 = arith.constant 255 : i32
    %25 = tpu.dynamic_rotate %0 by %c255_i32 dim 2 : vector<2x10x256xf32>, i32 -> vector<2x10x256xf32>
    %26 = vector.shape_cast %21 : vector<1x1x256xi1> to vector<1x1x256xi1>
    %27 = vector.broadcast %26 : vector<1x1x256xi1> to vector<2x10x256xi1>
    %28 = arith.select %27, %24, %25 : vector<2x10x256xi1>, vector<2x10x256xf32>
    %c241_i32 = arith.constant 241 : i32
    %29 = tpu.dynamic_rotate %0 by %c241_i32 dim 2 : vector<2x10x256xf32>, i32 -> vector<2x10x256xf32>
    %c1_i32_8 = arith.constant 1 : i32
    %30 = tpu.dynamic_rotate %0 by %c1_i32_8 dim 2 : vector<2x10x256xf32>, i32 -> vector<2x10x256xf32>
    %31 = vector.shape_cast %23 : vector<1x1x256xi1> to vector<1x1x256xi1>
    %32 = vector.broadcast %31 : vector<1x1x256xi1> to vector<2x10x256xi1>
    %33 = arith.select %32, %29, %30 : vector<2x10x256xi1>, vector<2x10x256xf32>
    %34 = tpu.iota {dimensions = array<i32: 1>} : vector<1x10x1xi32>
    %c5_i32 = arith.constant 5 : i32
    %c0_i32_9 = arith.constant 0 : i32
    %35 = arith.cmpi eq, %c5_i32, %c0_i32_9 : i32
    %c1_i32_10 = arith.constant 1 : i32
    %36 = arith.select %35, %c1_i32_10, %c5_i32 : i32
    %37 = vector.broadcast %36 : i32 to vector<1x10x1xi32>
    %38 = arith.remsi %34, %37 : vector<1x10x1xi32>
    %c0_i32_11 = arith.constant 0 : i32
    %39 = vector.broadcast %c0_i32_11 : i32 to vector<1x10x1xi32>
    %40 = arith.cmpi ne, %38, %39 : vector<1x10x1xi32>
    %c0_i32_12 = arith.constant 0 : i32
    %41 = vector.broadcast %c0_i32_12 : i32 to vector<1x10x1xi32>
    %42 = arith.cmpi slt, %38, %41 : vector<1x10x1xi32>
    %c0_i32_13 = arith.constant 0 : i32
    %43 = arith.cmpi slt, %36, %c0_i32_13 : i32
    %44 = vector.broadcast %43 : i1 to vector<1x10x1xi1>
    %45 = vector.broadcast %44 : vector<1x10x1xi1> to vector<1x10x1xi1>
    %46 = arith.xori %42, %45 : vector<1x10x1xi1>
    %47 = arith.andi %46, %40 : vector<1x10x1xi1>
    %48 = vector.broadcast %36 : i32 to vector<1x10x1xi32>
    %49 = arith.addi %38, %48 : vector<1x10x1xi32>
    %50 = arith.select %47, %49, %38 : vector<1x10x1xi1>, vector<1x10x1xi32>
    %c0_i32_14 = arith.constant 0 : i32
    %51 = vector.broadcast %c0_i32_14 : i32 to vector<1x10x1xi32>
    %52 = arith.cmpi eq, %50, %51 : vector<1x10x1xi32>
    %53 = arith.extui %52 : vector<1x10x1xi1> to vector<1x10x1xi32>
    %54 = arith.sitofp %53 : vector<1x10x1xi32> to vector<1x10x1xf32>
    %c1_i32_15 = arith.constant 1 : i32
    %55 = vector.broadcast %c1_i32_15 : i32 to vector<1x10x1xi32>
    %56 = arith.cmpi eq, %50, %55 : vector<1x10x1xi32>
    %57 = arith.extui %56 : vector<1x10x1xi1> to vector<1x10x1xi32>
    %58 = arith.sitofp %57 : vector<1x10x1xi32> to vector<1x10x1xf32>
    %c2_i32 = arith.constant 2 : i32
    %59 = vector.broadcast %c2_i32 : i32 to vector<1x10x1xi32>
    %60 = arith.cmpi eq, %50, %59 : vector<1x10x1xi32>
    %61 = arith.extui %60 : vector<1x10x1xi1> to vector<1x10x1xi32>
    %62 = arith.sitofp %61 : vector<1x10x1xi32> to vector<1x10x1xf32>
    %c3_i32 = arith.constant 3 : i32
    %63 = vector.broadcast %c3_i32 : i32 to vector<1x10x1xi32>
    %64 = arith.cmpi eq, %50, %63 : vector<1x10x1xi32>
    %65 = arith.extui %64 : vector<1x10x1xi1> to vector<1x10x1xi32>
    %66 = arith.sitofp %65 : vector<1x10x1xi32> to vector<1x10x1xf32>
    %c4_i32 = arith.constant 4 : i32
    %67 = vector.broadcast %c4_i32 : i32 to vector<1x10x1xi32>
    %68 = arith.cmpi eq, %50, %67 : vector<1x10x1xi32>
    %69 = arith.extui %68 : vector<1x10x1xi1> to vector<1x10x1xi32>
    %70 = arith.sitofp %69 : vector<1x10x1xi32> to vector<1x10x1xf32>
    %71 = vector.broadcast %54 : vector<1x10x1xf32> to vector<2x10x256xf32>
    %72 = arith.mulf %71, %28 : vector<2x10x256xf32>
    %73 = vector.broadcast %58 : vector<1x10x1xf32> to vector<2x10x256xf32>
    %74 = arith.mulf %73, %33 : vector<2x10x256xf32>
    %75 = arith.addf %72, %74 : vector<2x10x256xf32>
    %76 = vector.broadcast %62 : vector<1x10x1xf32> to vector<2x10x256xf32>
    %77 = arith.mulf %76, %1 : vector<2x10x256xf32>
    %78 = arith.addf %75, %77 : vector<2x10x256xf32>
    %79 = vector.broadcast %66 : vector<1x10x1xf32> to vector<2x10x256xf32>
    %80 = arith.mulf %79, %2 : vector<2x10x256xf32>
    %81 = arith.addf %78, %80 : vector<2x10x256xf32>
    %82 = vector.broadcast %70 : vector<1x10x1xf32> to vector<2x10x256xf32>
    %83 = arith.mulf %82, %0 : vector<2x10x256xf32>
    %84 = arith.addf %81, %83 : vector<2x10x256xf32>
    %85 = arith.subf %84, %0 : vector<2x10x256xf32>
    %cst = arith.constant dense<0.000000e+00> : vector<2x10xf32>
    %86 = vector.multi_reduction <add>, %85, %cst [2] : vector<2x10x256xf32> to vector<2x10xf32>
    %87 = vector.shape_cast %86 : vector<2x10xf32> to vector<2x10x1xf32>
    %cst_16 = arith.constant dense<0.000000e+00> : vector<10x1xf32>
    %88 = vector.multi_reduction <add>, %87, %cst_16 [0] : vector<2x10x1xf32> to vector<10x1xf32>
    %89 = vector.shape_cast %88 : vector<10x1xf32> to vector<1x10x1xf32>
    %90 = arith.mulf %85, %85 : vector<2x10x256xf32>
    %cst_17 = arith.constant dense<0.000000e+00> : vector<2x10xf32>
    %91 = vector.multi_reduction <add>, %90, %cst_17 [2] : vector<2x10x256xf32> to vector<2x10xf32>
    %92 = vector.shape_cast %91 : vector<2x10xf32> to vector<2x10x1xf32>
    %cst_18 = arith.constant dense<0.000000e+00> : vector<10x1xf32>
    %93 = vector.multi_reduction <add>, %92, %cst_18 [0] : vector<2x10x1xf32> to vector<10x1xf32>
    %94 = vector.shape_cast %93 : vector<10x1xf32> to vector<1x10x1xf32>
    %cst_19 = arith.constant 0.001953125 : f32
    %95 = vector.broadcast %cst_19 : f32 to vector<1x10x1xf32>
    %96 = arith.mulf %89, %95 : vector<1x10x1xf32>
    %cst_20 = arith.constant 0.001953125 : f32
    %97 = vector.broadcast %cst_20 : f32 to vector<1x10x1xf32>
    %98 = arith.mulf %94, %97 : vector<1x10x1xf32>
    %99 = arith.mulf %96, %96 : vector<1x10x1xf32>
    %100 = arith.subf %98, %99 : vector<1x10x1xf32>
    %cst_21 = arith.constant 0.000000e+00 : f32
    %101 = vector.broadcast %cst_21 : f32 to vector<1x10x1xf32>
    %102 = arith.maximumf %100, %101 : vector<1x10x1xf32>
    %cst_22 = arith.constant 9.99999974E-6 : f32
    %103 = vector.broadcast %cst_22 : f32 to vector<1x10x1xf32>
    %104 = arith.addf %102, %103 : vector<1x10x1xf32>
    %105 = math.rsqrt %104 : vector<1x10x1xf32>
    %c0_23 = arith.constant 0 : index
    %c0_24 = arith.constant 0 : index
    %c0_25 = arith.constant 0 : index
    %106 = vector.load %arg2[%c0_23, %c0_24, %c0_25] : memref<1x10x1xf32, #tpu.memory_space<vmem>>, vector<1x10x1xf32>
    %c0_26 = arith.constant 0 : index
    %c0_27 = arith.constant 0 : index
    %c0_28 = arith.constant 0 : index
    %107 = vector.load %arg3[%c0_26, %c0_27, %c0_28] : memref<1x10x1xf32, #tpu.memory_space<vmem>>, vector<1x10x1xf32>
    %108 = vector.broadcast %96 : vector<1x10x1xf32> to vector<2x10x256xf32>
    %109 = arith.subf %85, %108 : vector<2x10x256xf32>
    %110 = arith.mulf %105, %106 : vector<1x10x1xf32>
    %111 = vector.broadcast %110 : vector<1x10x1xf32> to vector<2x10x256xf32>
    %112 = arith.mulf %109, %111 : vector<2x10x256xf32>
    %113 = vector.broadcast %107 : vector<1x10x1xf32> to vector<2x10x256xf32>
    %114 = arith.addf %112, %113 : vector<2x10x256xf32>
    %c0_29 = arith.constant 0 : index
    %c0_30 = arith.constant 0 : index
    %c0_31 = arith.constant 0 : index
    %115 = vector.load %arg4[%c0_29, %c0_30, %c0_31] : memref<2x10x256xf32, #tpu.memory_space<vmem>>, vector<2x10x256xf32>
    tpu.vector_store %arg4[%c0_29, %c0_30, %c0_31], %114 {strides = array<i32>} : memref<2x10x256xf32, #tpu.memory_space<vmem>>, vector<2x10x256xf32>,
    return
  }
  func.func @transform_0(%arg0: i32) -> (i32, i32, i32) {
    %c0_i32 = arith.constant 0 : i32
    %c0_i32_0 = arith.constant 0 : i32
    %c0_i32_1 = arith.constant 0 : i32
    return %c0_i32, %arg0, %c0_i32_0 : i32, i32, i32
  }
  func.func @transform_1(%arg0: i32) -> (i32, i32, i32) {
    %c0_i32 = arith.constant 0 : i32
    %c0_i32_0 = arith.constant 0 : i32
    %c0_i32_1 = arith.constant 0 : i32
    return %c0_i32, %arg0, %c0_i32_0 : i32, i32, i32
  }
  func.func @transform_2(%arg0: i32) -> (i32, i32, i32) {
    %c0_i32 = arith.constant 0 : i32
    %c0_i32_0 = arith.constant 0 : i32
    %c0_i32_1 = arith.constant 0 : i32
    return %c0_i32, %arg0, %c0_i32_0 : i32, i32, i32
  }
  func.func @transform_3(%arg0: i32) -> (i32, i32, i32) {
    %c0_i32 = arith.constant 0 : i32
    %c0_i32_0 = arith.constant 0 : i32
    %c0_i32_1 = arith.constant 0 : i32
    return %c0_i32, %arg0, %c0_i32_0 : i32, i32, i32
  }
}

</mosaic_0001>

<bundles_post_ra>
// kernel: tpu_custom_call.1
= control target key start
LH: loop header
LB: loop body
LE: loop exit
PB: predicated region body
PF: predicated region fallthrough
CT: control target
= control target key end

     0   :  { %s576_s18 = smov 112   ;;  %s577_s29 = smov 16   ;;  %v38_v8 = vlaneseq  ;;  %v582_v17 = vmov 0   ;;  %v583_v61 = vmov 0.0   ;;  %s1113_s0 = inlined_call_operand.vmem [shape: f32[2,10,256], index: 0, kind: input, shape index: {}]   ;;  %s1114_s2 = inlined_call_operand.vmem [shape: f32[1,10,1], index: 2, kind: input, shape index: {}]   ;;  %s1115_s1 = inlined_call_operand.vmem [shape: f32[1,10,1], index: 1, kind: input, shape index: {}]   ;;  %s1116_s3 = inlined_call_operand.vmem [shape: f32[2,10,256], index: 3, kind: output, shape index: {}]  }
   0x1   :  { %v607_v0 = vld [vmem:[%s1113_s0 + $0x20] sm:$0xff]  ;;  %v612_v1 = vld [vmem:[%s1113_s0 + $0x8] sm:$0xff]  ;;  %v625_v3 = vld [vmem:[%s1113_s0 + $0x30] sm:$0x3]  ;;  %s578_s30 = smov 15   ;;  %s580_s4 = smov 113   ;;  %570 = vset.pattern.permute.xlu2 %v582_v17  ;;  %569 = vset.pattern.permute.xlu1 %v582_v17 }
   0x2   :  { %v617_v2 = vld [vmem:[%s1113_s0] sm:$0xff]  ;;  %26 = vrot.lane.b32.xlu1 %v607_v0, %s576_s18  ;;  %30 = vrot.lane.b32.xlu2 %v612_v1, %s576_s18  ;;  %v630_v4 = vld [vmem:[%s1113_s0 + $0x18] sm:$0x3]  ;;  %v683_v9 = vshrl.u32 %v38_v8, 7  ;;  %s581_s5 = smov 1   ;;  %v735_v57 = vand.u32 127, %v38_v8 }
   0x3   :  { %22 = vrot.lane.b32.xlu0 %v617_v2, %s576_s18  ;;  %v635_v5 = vld [vmem:[%s1113_s0 + $0x10] sm:$0x3]  ;;  %v643_v6 = vld [vmem:[%s1113_s0 + $0x38] sm:$0x3]  ;;  %v648_v7 = vld [vmem:[%s1113_s0 + $0x28] sm:$0xff]  ;;  %s579_s0 = smov 127  }
   0x4   :  { %v233_v10 = vand.u32 65535, %v683_v9  ;;  %v234_v11 = vshrl.u32 %v683_v9, 16  ;;  %v696_v16 = vadd.s32 8, %v683_v9  ;;  %571 = vset.pattern.permute.xlu0 %v582_v17  ;;  %vm40_vm10 = vcmp.lt.s32.totalorder %v735_v57, 112 }
   0x5   :  { %vm65_vm14 = vcmp.lt.s32.totalorder %v735_v57, 16  ;;  %vm119_vm15 = vcmp.lt.s32.totalorder %v735_v57, 15 }
   0x6   :  { %v237_v12 = vmul.u32 52428, %v233_v10  ;;  %v236_v13 = vmul.u32 52429, %v233_v10  ;;  %v238_v14 = vmul.u32 52429, %v234_v11  ;;  %v262_v18 = vand.u32 65535, %v696_v16 }
   0x7   :  { %v263_v21 = vshrl.u32 %v696_v16, 16  ;;  %v239_v23 = vmul.u32 52428, %v234_v11 }
   0x8   :  { %v240_v15 = vshll.u32 %v237_v12, 16  ;;  %v242_v19 = vshll.u32 %v238_v14, 16  ;;  %v266_v22 = vmul.u32 52428, %v262_v18  ;;  %v265_v25 = vmul.u32 52429, %v262_v18 }
   0x9   :  { %v267_v26 = vmul.u32 52429, %v263_v21  ;;  %v241_v32 = vshrl.u32 %v237_v12, 16  ;;  %v268_v34 = vmul.u32 52428, %v263_v21  ;;  %v243_v36 = vshrl.u32 %v238_v14, 16 }
   0xa   :  { %28 = vrot.lane.b32.xlu1 %v625_v3, %s576_s18  ;;  %32 = vrot.lane.b32.xlu2 %v630_v4, %s576_s18  ;;  %vm244_vm0 = vc.u32 %v236_v13, %v240_v15  ;;  %v246_v20 = vadd.s32 %v240_v15, %v236_v13  ;;  %v269_v27 = vshll.u32 %v266_v22, 16  ;;  %v270_v41 = vshrl.u32 %v266_v22, 16 }
   0xb   :  { %24 = vrot.lane.b32.xlu0 %v635_v5, %s576_s18  ;;  %v245_v24 = vsel %vm244_vm0, 1, %v582_v17  ;;  %v271_v30 = vshll.u32 %v267_v26, 16  ;;  %v272_v45 = vshrl.u32 %v267_v26, 16 }
   0xc   :  { %vm248_vm1 = vc.u32 %v246_v20, %v242_v19  ;;  %v247_v28 = vadd.s32 %v245_v24, %v239_v23  ;;  %vm273_vm2 = vc.u32 %v265_v25, %v269_v27  ;;  %v275_v31 = vadd.s32 %v269_v27, %v265_v25 }
   0xd   :  { %v249_v29 = vsel %vm248_vm1, 1, %v582_v17  ;;  %v274_v35 = vsel %vm273_vm2, 1, %v582_v17  ;;  %vm144_vm1 = vcmp.lt.s32.totalorder %v735_v57, 127 }
   0xe   :  { %v251_v33 = vadd.s32 %v249_v29, %v247_v28  ;;  %vm277_vm3 = vc.u32 %v275_v31, %v271_v30  ;;  %v276_v38 = vadd.s32 %v274_v35, %v268_v34 }
   0xf   :  { %v278_v39 = vsel %vm277_vm3, 1, %v582_v17 }
  0x10   :  { %v252_v37 = vadd.s32 %v251_v33, %v241_v32  ;;  %v280_v42 = vadd.s32 %v278_v39, %v276_v38 }
  0x12   :  { %36 = vrot.lane.b32.xlu1 %v643_v6, %s576_s18  ;;  %49 = vrot.lane.b32.xlu2 %v617_v2, %s577_s29  ;;  %v253_v40 = vadd.s32 %v252_v37, %v243_v36  ;;  %v281_v46 = vadd.s32 %v280_v42, %v270_v41 }
  0x13   :  { %34 = vrot.lane.b32.xlu0 %v648_v7, %s576_s18 }
  0x14   :  { %v254_v44 = vshrl.u32 %v253_v40, 2  ;;  %v282_v48 = vadd.s32 %v281_v46, %v272_v45 }
  0x16   :  { %v255_v47 = vmul.u32 5, %v254_v44  ;;  %v283_v51 = vshrl.u32 %v282_v48, 2 }
  0x18   :  { %v256_v50 = vsub.s32 %v683_v9, %v255_v47  ;;  %v284_v52 = vmul.u32 5, %v283_v51 }
  0x1a   :  { %53 = vrot.lane.b32.xlu1 %v607_v0, %s577_s29  ;;  %55 = vrot.lane.b32.xlu2 %v625_v3, %s577_s29  ;;  %vm288_vm4 = vcmp.ne.s32.totalorder %v256_v50, 0  ;;  %vm290_vm5 = vcmp.lt.s32.totalorder %v256_v50, 0  ;;  %v294_v53 = vadd.s32 5, %v256_v50  ;;  %v285_v55 = vsub.s32 %v696_v16, %v284_v52 }
  0x1b   :  { %51 = vrot.lane.b32.xlu0 %v635_v5, %s577_s29  ;;  %vm292_vm6 = vmand %vm290_vm5, %vm288_vm4  ;;  %vm181_vm4 = vcmp.lt.s32.totalorder %v735_v57, 113 }
  0x1c   :  { %v732_v56 = vsel %vm292_vm6, %v294_v53, %v256_v50  ;;  %vm289_vm7 = vcmp.ne.s32.totalorder %v285_v55, 0  ;;  %vm291_vm8 = vcmp.lt.s32.totalorder %v285_v55, 0  ;;  %v295_v58 = vadd.s32 5, %v285_v55 }
  0x1d   :  { %vm310_vm9 = vcmp.eq.s32.totalorder %v732_v56, 2  ;;  %vm293_vm11 = vmand %vm291_vm8, %vm289_vm7  ;;  %vm316_vm13 = vcmp.eq.s32.totalorder %v732_v56, 3  ;;  %v79_v50 = vand.u32 15, %v735_v57  ;;  %vm206_vm6 = vcmp.lt.s32.totalorder %v735_v57, 1 }
  0x1e   :  { %v555_v62 = vsel %vm310_vm9, 1.0, %v583_v61  ;;  %v752_v10 = vsel %vm293_vm11, %v295_v58, %v285_v55  ;;  %v797_v36 = vsel %vm316_vm13, 1.0, %v583_v61  ;;  %vm322_vm11 = vcmp.eq.s32.totalorder %v732_v56, 4 }
  0x1f   :  { %vm311_vm12 = vcmp.eq.s32.totalorder %v752_v10, 2  ;;  %vm299_vm0 = vcmp.eq.s32.totalorder %v752_v10, 0  ;;  %vm822_vm2 = vcmp.eq.s32.totalorder %v79_v50, 15  ;;  %vm305_vm5 = vcmp.eq.s32.totalorder %v752_v10, 1 }
  0x20   :  { %v556_v15 = vsel %vm311_vm12, 1.0, %v583_v61  ;;  %v552_v55 = vsel %vm299_vm0, 1.0, %v583_v61  ;;  %vm852_vm7 = vcmp.eq.s32.totalorder %v79_v50, 0  ;;  %vm323_vm9 = vcmp.eq.s32.totalorder %v752_v10, 4 }
  0x21   :  { %vm304_vm12 = vcmp.eq.s32.totalorder %v732_v56, 1  ;;  %vm317_vm13 = vcmp.eq.s32.totalorder %v752_v10, 3 }
  0x22   :  { %105 = vrot.lane.b32.xlu1 %v635_v5, %s578_s30  ;;  %109 = vrot.lane.b32.xlu2 %v625_v3, %s578_s30 }
  0x23   :  { %57 = vrot.lane.b32.xlu0 %v612_v1, %s577_s29 }
  0x2a   :  { %117 = vrot.lane.b32.xlu1 %v643_v6, %s578_s30  ;;  %130 = vrot.lane.b32.xlu2 %v635_v5, %s579_s0 }
  0x2b   :  { %113 = vrot.lane.b32.xlu0 %v630_v4, %s578_s30 }
  0x32   :  { %138 = vrot.lane.b32.xlu1 %v630_v4, %s579_s0  ;;  %142 = vrot.lane.b32.xlu2 %v643_v6, %s579_s0 }
  0x33   :  { %134 = vrot.lane.b32.xlu0 %v625_v3, %s579_s0 }
  0x3a   :  { %171 = vrot.lane.b32.xlu1 %v625_v3, %s580_s4  ;;  %175 = vrot.lane.b32.xlu2 %v630_v4, %s580_s4 }
  0x3b   :  { %167 = vrot.lane.b32.xlu0 %v635_v5, %s580_s4 }
  0x42   :  { %192 = vrot.lane.b32.xlu1 %v635_v5, %s581_s5  ;;  %196 = vrot.lane.b32.xlu2 %v625_v3, %s581_s5 }
  0x43   :  { %179 = vrot.lane.b32.xlu0 %v643_v6, %s580_s4 }
  0x4a   :  { %204 = vrot.lane.b32.xlu1 %v643_v6, %s581_s5  ;;  %103 = vrot.lane.b32.xlu2 %v617_v2, %s578_s30 }
  0x4b   :  { %200 = vrot.lane.b32.xlu0 %v630_v4, %s581_s5 }
  0x52   :  { %111 = vrot.lane.b32.xlu1 %v612_v1, %s578_s30  ;;  %115 = vrot.lane.b32.xlu2 %v648_v7, %s578_s30 }
  0x53   :  { %107 = vrot.lane.b32.xlu0 %v607_v0, %s578_s30 }
  0x5a   :  { %132 = vrot.lane.b32.xlu1 %v607_v0, %s579_s0  ;;  %136 = vrot.lane.b32.xlu2 %v612_v1, %s579_s0 }
  0x5b   :  { %128 = vrot.lane.b32.xlu0 %v617_v2, %s579_s0 }
  0x5c   :  { %v31_v43 = vpop.permute.xlu2 %30 }
  0x62   :  { %165 = vrot.lane.b32.xlu1 %v617_v2, %s580_s4  ;;  %169 = vrot.lane.b32.xlu2 %v607_v0, %s580_s4 }
  0x63   :  { %140 = vrot.lane.b32.xlu0 %v648_v7, %s579_s0 }
  0x64   :  { %v33_v49 = vpop.permute.xlu2 %32 }
  0x6a   :  { %177 = vrot.lane.b32.xlu1 %v648_v7, %s580_s4  ;;  %190 = vrot.lane.b32.xlu2 %v617_v2, %s581_s5 }
  0x6b   :  { %173 = vrot.lane.b32.xlu0 %v612_v1, %s580_s4 }
  0x6c   :  { %v50_v54 = vpop.permute.xlu2 %49 }
  0x72   :  { %198 = vrot.lane.b32.xlu1 %v612_v1, %s581_s5  ;;  %202 = vrot.lane.b32.xlu2 %v648_v7, %s581_s5 }
  0x73   :  { %194 = vrot.lane.b32.xlu0 %v607_v0, %s581_s5 }
  0x74   :  { %v27_v59 = vpop.permute.xlu1 %26  ;;  %v745_v60 = vpop.permute.xlu2 %55 }
  0x75   :  { %v23_v63 = vpop.permute.xlu0 %22 }
  0x76   :  { %v41_v8 = vsel %vm40_vm10, %v23_v63, %v31_v43  ;;  %v45_v9 = vsel %vm40_vm10, %v31_v43, %v23_v63  ;;  %v74_v43 = vadd.s32 128, %v735_v57 }
  0x77   :  { %v754_v11 = vmul.f32 %v555_v62, %v41_v8  ;;  %v756_v12 = vmul.f32 %v555_v62, %v45_v9 }
  0x78   :  { %v86_v51 = vand.u32 15, %v74_v43  ;;  %v554_v43 = vsel %vm305_vm5, 1.0, %v583_v61 }
  0x7a   :  { %63 = vrot.lane.b32.xlu1 %v643_v6, %s577_s29  ;;  %61 = vrot.lane.b32.xlu2 %v648_v7, %s577_s29  ;;  %vm826_vm3 = vcmp.eq.s32.totalorder %v86_v51, 15  ;;  %vm856_vm8 = vcmp.eq.s32.totalorder %v86_v51, 0 }
  0x7b   :  { %59 = vrot.lane.b32.xlu0 %v630_v4, %s577_s29 }
  0x7c   :  { %v29_v13 = vpop.permute.xlu1 %28  ;;  %v110_v14 = vpop.permute.xlu2 %109 }
  0x7d   :  { %v25_v16 = vpop.permute.xlu0 %24 }
  0x7e   :  { %v42_v17 = vsel %vm40_vm10, %v25_v16, %v33_v49  ;;  %v46_v18 = vsel %vm40_vm10, %v33_v49, %v25_v16 }
  0x7f   :  { %v770_v19 = vmul.f32 %v556_v15, %v42_v17  ;;  %v772_v20 = vmul.f32 %v556_v15, %v46_v18 }
  0x84   :  { %v37_v21 = vpop.permute.xlu1 %36  ;;  %v131_v22 = vpop.permute.xlu2 %130 }
  0x85   :  { %v44_v23 = vsel %vm40_vm10, %v29_v13, %v37_v21  ;;  %v48_v24 = vsel %vm40_vm10, %v37_v21, %v29_v13  ;;  %v35_v25 = vpop.permute.xlu0 %34 }
  0x86   :  { %v778_v26 = vmul.f32 %v556_v15, %v44_v23  ;;  %v780_v27 = vmul.f32 %v556_v15, %v48_v24  ;;  %v43_v28 = vsel %vm40_vm10, %v27_v59, %v35_v25  ;;  %v47_v29 = vsel %vm40_vm10, %v35_v25, %v27_v59 }
  0x87   :  { %v786_v30 = vmul.f32 %v555_v62, %v43_v28  ;;  %v788_v31 = vmul.f32 %v555_v62, %v47_v29  ;;  %vm298_vm10 = vcmp.eq.s32.totalorder %v732_v56, 0  ;;  %v559_v56 = vsel %vm322_vm11, 1.0, %v583_v61 }
  0x8c   :  { %v790_v32 = vpop.permute.xlu1 %53  ;;  %v143_v33 = vpop.permute.xlu2 %142 }
  0x8d   :  { %v792_v34 = vpop.permute.xlu0 %51 }
  0x94   :  { %v106_v35 = vpop.permute.xlu1 %105  ;;  %v176_v38 = vpop.permute.xlu2 %175 }
  0x95   :  { %v58_v37 = vpop.permute.xlu0 %57 }
  0x96   :  { %v66_v39 = vsel %vm65_vm14, %v50_v54, %v58_v37  ;;  %v70_v40 = vsel %vm65_vm14, %v58_v37, %v50_v54  ;;  %v389_v37 = vmul.f32 %v559_v56, %v648_v7 }
  0x97   :  { %v804_v41 = vmul.f32 %v797_v36, %v70_v40  ;;  %v807_v42 = vmul.f32 %v797_v36, %v66_v39 }
  0x9c   :  { %v118_v44 = vpop.permute.xlu1 %117  ;;  %v197_v52 = vpop.permute.xlu2 %196 }
  0x9d   :  { %v123_v45 = vsel %vm119_vm15, %v110_v14, %v118_v44  ;;  %v127_v46 = vsel %vm119_vm15, %v118_v44, %v110_v14  ;;  %v114_v47 = vpop.permute.xlu0 %113 }
  0x9e   :  { %v121_v48 = vsel %vm119_vm15, %v106_v35, %v114_v47  ;;  %v125_v49 = vsel %vm119_vm15, %v114_v47, %v106_v35 }
  0xa4   :  { %v139_v58 = vpop.permute.xlu1 %138  ;;  %v104_v23 = vpop.permute.xlu2 %103 }
  0xa5   :  { %v146_v59 = vsel %vm144_vm1, %v131_v22, %v139_v58  ;;  %v150_v62 = vsel %vm144_vm1, %v139_v58, %v131_v22  ;;  %v135_v63 = vpop.permute.xlu0 %134 }
  0xa6   :  { %v159_v8 = vsel %vm822_vm2, %v125_v49, %v146_v59  ;;  %v160_v9 = vsel %vm826_vm3, %v121_v48, %v150_v62  ;;  %v148_v13 = vsel %vm144_vm1, %v135_v63, %v143_v33  ;;  %v152_v14 = vsel %vm144_vm1, %v143_v33, %v135_v63 }
  0xa7   :  { %v330_v15 = vmul.f32 %v552_v55, %v159_v8  ;;  %v331_v16 = vmul.f32 %v552_v55, %v160_v9  ;;  %v163_v17 = vsel %vm822_vm2, %v127_v46, %v148_v13  ;;  %v164_v18 = vsel %vm826_vm3, %v123_v45, %v152_v14 }
  0xa8   :  { %v334_v21 = vmul.f32 %v552_v55, %v163_v17  ;;  %v335_v22 = vmul.f32 %v552_v55, %v164_v18 }
  0xac   :  { %v172_v24 = vpop.permute.xlu1 %171  ;;  %v847_v28 = vpop.permute.xlu2 %115 }
  0xad   :  { %v168_v25 = vpop.permute.xlu0 %167 }
  0xae   :  { %v183_v39 = vsel %vm181_vm4, %v168_v25, %v176_v38  ;;  %v187_v40 = vsel %vm181_vm4, %v176_v38, %v168_v25 }
  0xb4   :  { %v193_v29 = vpop.permute.xlu1 %192  ;;  %v137_v50 = vpop.permute.xlu2 %136 }
  0xb5   :  { %v180_v35 = vpop.permute.xlu0 %179 }
  0xb6   :  { %v185_v45 = vsel %vm181_vm4, %v172_v24, %v180_v35  ;;  %v189_v46 = vsel %vm181_vm4, %v180_v35, %v172_v24 }
  0xbc   :  { %v205_v44 = vpop.permute.xlu1 %204 }
  0xbd   :  { %v210_v47 = vsel %vm206_vm6, %v197_v52, %v205_v44  ;;  %v214_v48 = vsel %vm206_vm6, %v205_v44, %v197_v52  ;;  %v201_v49 = vpop.permute.xlu0 %200  ;;  %v170_v44 = vpop.permute.xlu2 %169 }
  0xbe   :  { %v225_v38 = vsel %vm852_vm7, %v185_v45, %v214_v48  ;;  %v226_v51 = vsel %vm856_vm8, %v189_v46, %v210_v47  ;;  %v208_v55 = vsel %vm206_vm6, %v193_v29, %v201_v49  ;;  %v212_v58 = vsel %vm206_vm6, %v201_v49, %v193_v29 }
  0xbf   :  { %v342_v59 = vmul.f32 %v554_v43, %v225_v38  ;;  %v343_v62 = vmul.f32 %v554_v43, %v226_v51  ;;  %v221_v63 = vsel %vm852_vm7, %v183_v39, %v212_v58  ;;  %v222_v52 = vsel %vm856_vm8, %v187_v40, %v208_v55 }
  0xc0   :  { %v338_v8 = vmul.f32 %v554_v43, %v221_v63  ;;  %v339_v9 = vmul.f32 %v554_v43, %v222_v52  ;;  %v560_v48 = vsel %vm323_vm9, 1.0, %v583_v61  ;;  %v551_v49 = vsel %vm298_vm10, 1.0, %v583_v61 }
  0xc1   :  { %v350_v13 = vadd.f32 %v342_v59, %v334_v21  ;;  %v351_v14 = vadd.f32 %v343_v62, %v335_v22  ;;  %v553_v55 = vsel %vm304_vm12, 1.0, %v583_v61  ;;  %v558_v59 = vsel %vm317_vm13, 1.0, %v583_v61 }
  0xc2   :  { %v346_v17 = vadd.f32 %v338_v8, %v330_v15  ;;  %v347_v18 = vadd.f32 %v339_v9, %v331_v16  ;;  %v930_v62 = vmul.f32 %v560_v48, %v625_v3  ;;  %v933_v63 = vmul.f32 %v560_v48, %v643_v6 }
  0xc3   :  { %v886_v24 = vadd.f32 %v778_v26, %v350_v13  ;;  %v889_v25 = vadd.f32 %v780_v27, %v351_v14  ;;  %v384_v9 = vmul.f32 %v559_v56, %v617_v2  ;;  %v385_v13 = vmul.f32 %v559_v56, %v612_v1 }
  0xc4   :  { %v112_v29 = vpop.permute.xlu1 %111  ;;  %v892_v35 = vadd.f32 %v770_v19, %v346_v17  ;;  %v895_v39 = vadd.f32 %v772_v20, %v347_v18 }
  0xc5   :  { %v108_v40 = vpop.permute.xlu0 %107  ;;  %v191_v22 = vpop.permute.xlu2 %190  ;;  %v120_v46 = vsel %vm119_vm15, %v104_v23, %v112_v29  ;;  %v124_v47 = vsel %vm119_vm15, %v112_v29, %v104_v23 }
  0xc6   :  { %v122_v51 = vsel %vm119_vm15, %v108_v40, %v847_v28  ;;  %v126_v58 = vsel %vm119_vm15, %v847_v28, %v108_v40 }
  0xcc   :  { %v133_v43 = vpop.permute.xlu1 %132 }
  0xcd   :  { %v129_v21 = vpop.permute.xlu0 %128  ;;  %v203_v45 = vpop.permute.xlu2 %202 }
  0xce   :  { %v145_v19 = vsel %vm144_vm1, %v129_v21, %v137_v50  ;;  %v149_v20 = vsel %vm144_vm1, %v137_v50, %v129_v21 }
  0xcf   :  { %v157_v50 = vsel %vm822_vm2, %v124_v47, %v145_v19  ;;  %v158_v38 = vsel %vm826_vm3, %v120_v46, %v149_v20 }
  0xd0   :  { %v328_v52 = vmul.f32 %v551_v49, %v157_v50  ;;  %v329_v8 = vmul.f32 %v551_v49, %v158_v38 }
  0xd4   :  { %v166_v15 = vpop.permute.xlu1 %165 }
  0xd5   :  { %v141_v16 = vpop.permute.xlu0 %140  ;;  %v62_v21 = vpop.permute.xlu2 %61 }
  0xd6   :  { %v147_v23 = vsel %vm144_vm1, %v133_v43, %v141_v16  ;;  %v151_v10 = vsel %vm144_vm1, %v141_v16, %v133_v43 }
  0xd7   :  { %v161_v14 = vsel %vm822_vm2, %v126_v58, %v147_v23  ;;  %v162_v28 = vsel %vm826_vm3, %v122_v51, %v151_v10  ;;  %v68_v51 = vsel %vm65_vm14, %v790_v32, %v62_v21 }
  0xd8   :  { %v332_v46 = vmul.f32 %v551_v49, %v161_v14  ;;  %v333_v47 = vmul.f32 %v551_v49, %v162_v28  ;;  %v386_v14 = vmul.f32 %v560_v48, %v635_v5  ;;  %v387_v28 = vmul.f32 %v560_v48, %v630_v4 }
  0xdc   :  { %v178_v26 = vpop.permute.xlu1 %177 }
  0xdd   :  { %v174_v27 = vpop.permute.xlu0 %173  ;;  %v184_v61 = vsel %vm181_vm4, %v170_v44, %v178_v26  ;;  %v188_v17 = vsel %vm181_vm4, %v178_v26, %v170_v44 }
  0xde   :  { %v182_v29 = vsel %vm181_vm4, %v166_v15, %v174_v27  ;;  %v186_v40 = vsel %vm181_vm4, %v174_v27, %v166_v15 }
  0xe4   :  { %v199_v18 = vpop.permute.xlu1 %198 }
  0xe5   :  { %v207_v53 = vsel %vm206_vm6, %v191_v22, %v199_v18  ;;  %v211_v54 = vsel %vm206_vm6, %v199_v18, %v191_v22  ;;  %v195_v43 = vpop.permute.xlu0 %194 }
  0xe6   :  { %v219_v16 = vsel %vm852_vm7, %v182_v29, %v211_v54  ;;  %v220_v44 = vsel %vm856_vm8, %v186_v40, %v207_v53  ;;  %v209_v26 = vsel %vm206_vm6, %v195_v43, %v203_v45  ;;  %v213_v15 = vsel %vm206_vm6, %v203_v45, %v195_v43 }
  0xe7   :  { %v336_v19 = vmul.f32 %v553_v55, %v219_v16  ;;  %v337_v20 = vmul.f32 %v553_v55, %v220_v44  ;;  %v223_v27 = vsel %vm852_vm7, %v184_v61, %v213_v15  ;;  %v224_v22 = vsel %vm856_vm8, %v188_v17, %v209_v26 }
  0xe8   :  { %v340_v50 = vmul.f32 %v553_v55, %v223_v27  ;;  %v341_v38 = vmul.f32 %v553_v55, %v224_v22  ;;  %v72_v45 = vsel %vm65_vm14, %v62_v21, %v790_v32  ;;  %v388_v61 = vmul.f32 %v559_v56, %v607_v0 }
  0xe9   :  { %v344_v23 = vadd.f32 %v336_v19, %v328_v52  ;;  %v345_v10 = vadd.f32 %v337_v20, %v329_v8  ;;  %v372_v17 = vmul.f32 %v797_v36, %v72_v45  ;;  %v373_v32 = vmul.f32 %v797_v36, %v68_v51 }
  0xea   :  { %v348_v58 = vadd.f32 %v340_v50, %v332_v46  ;;  %v349_v33 = vadd.f32 %v341_v38, %v333_v47 }
  0xeb   :  { %v360_v49 = vadd.f32 %v754_v11, %v344_v23  ;;  %v361_v55 = vadd.f32 %v756_v12, %v345_v10 }
  0xec   :  { %v364_v52 = vadd.f32 %v786_v30, %v348_v58  ;;  %v365_v8 = vadd.f32 %v788_v31, %v349_v33  ;;  %v64_v18 = vpop.permute.xlu1 %63 }
  0xed   :  { %v69_v56 = vsel %vm65_vm14, %v745_v60, %v64_v18  ;;  %v73_v11 = vsel %vm65_vm14, %v64_v18, %v745_v60  ;;  %v60_v12 = vpop.permute.xlu0 %59  ;;  %v376_v48 = vadd.f32 %v804_v41, %v360_v49  ;;  %v377_v29 = vadd.f32 %v807_v42, %v361_v55 }
  0xee   :  { %v374_v40 = vmul.f32 %v558_v59, %v73_v11  ;;  %v375_v36 = vmul.f32 %v558_v59, %v69_v56  ;;  %v67_v30 = vsel %vm65_vm14, %v792_v34, %v60_v12  ;;  %v71_v31 = vsel %vm65_vm14, %v60_v12, %v792_v34 }
  0xef   :  { %v370_v53 = vmul.f32 %v558_v59, %v71_v31  ;;  %v371_v54 = vmul.f32 %v558_v59, %v67_v30  ;;  %v392_v43 = vadd.f32 %v384_v9, %v376_v48  ;;  %v393_v21 = vadd.f32 %v385_v13, %v377_v29 }
  0xf0   :  { %v382_v60 = vadd.f32 %v374_v40, %v886_v24  ;;  %v383_v41 = vadd.f32 %v375_v36, %v889_v25  ;;  %v380_v16 = vadd.f32 %v372_v17, %v364_v52  ;;  %v381_v42 = vadd.f32 %v373_v32, %v365_v8 }
  0xf1   :  { %v378_v44 = vadd.f32 %v370_v53, %v892_v35  ;;  %v379_v26 = vadd.f32 %v371_v54, %v895_v39  ;;  %v1000_v15 = vsub.f32 %v392_v43, %v617_v2  ;;  %v1003_v57 = vsub.f32 %v393_v21, %v612_v1  ;;  %v491_v43 = vld [vmem:[%s1114_s2] sm:$0xff] }
  0xf2   :  { %v398_v34 = vadd.f32 %v930_v62, %v382_v60  ;;  %v399_v59 = vadd.f32 %v933_v63, %v383_v41  ;;  %v396_v9 = vadd.f32 %v388_v61, %v380_v16  ;;  %v397_v24 = vadd.f32 %v389_v37, %v381_v42 }
  0xf3   :  { %v394_v13 = vadd.f32 %v386_v14, %v378_v44  ;;  %v395_v25 = vadd.f32 %v387_v28, %v379_v26  ;;  %v408_v19 = vadd.f32 %v1003_v57, %v1000_v15  ;;  %vm411_vm14 = vcmask 1041408  }
  0xf4   :  { %v1010_v35 = vsub.f32 %v398_v34, %v625_v3  ;;  %v1013_v2 = vsub.f32 %v399_v59, %v643_v6  ;;  %v1026_v20 = vsub.f32 %v396_v9, %v607_v0  ;;  %v1033_v27 = vsub.f32 %v397_v24, %v648_v7 }
  0xf5   :  { %409 = vadd.xlane.f32.xlu2 %v408_v19  ;;  %v1016_v1 = vsub.f32 %v394_v13, %v635_v5  ;;  %v1019_v39 = vsub.f32 %v395_v25, %v630_v4  ;;  %v429_v10 = vmul.f32 %v1000_v15, %v1000_v15  ;;  %v430_v58 = vmul.f32 %v1003_v57, %v1003_v57 }
  0xf6   :  { %v420_v62 = vsel %vm411_vm14, %v1010_v35, 0.0  ;;  %v421_v63 = vsel %vm411_vm14, %v1013_v2, 0.0  ;;  %v435_v22 = vmul.f32 %v1010_v35, %v1010_v35  ;;  %v436_v46 = vmul.f32 %v1013_v2, %v1013_v2 }
  0xf7   :  { %v422_v3 = vadd.f32 %v421_v63, %v420_v62  ;;  %v412_v6 = vsel %vm411_vm14, %v1016_v1, 0.0  ;;  %v413_v5 = vsel %vm411_vm14, %v1019_v39, 0.0  ;;  %v431_v0 = vmul.f32 %v1016_v1, %v1016_v1 }
  0xf8   :  { %v414_v4 = vadd.f32 %v413_v5, %v412_v6  ;;  %v432_v47 = vmul.f32 %v1019_v39, %v1019_v39  ;;  %v417_v50 = vadd.f32 %v1033_v27, %v1026_v20  ;;  %v448_v7 = vsel %vm411_vm14, %v435_v22, 0.0  ;;  %v490_v5 = vld [vmem:[%s1115_s1 + $0x8] sm:$0x3] }
  0xf9   :  { %423 = vadd.xlane.f32.xlu1 %v422_v3  ;;  %v449_v38 = vsel %vm411_vm14, %v436_v46, 0.0  ;;  %v440_v51 = vsel %vm411_vm14, %v431_v0, 0.0  ;;  %v437_v61 = vadd.f32 %v430_v58, %v429_v10  ;;  %v433_v37 = vmul.f32 %v1026_v20, %v1026_v20 }
  0xfa   :  { %415 = vadd.xlane.f32.xlu0 %v414_v4  ;;  %v441_v45 = vsel %vm411_vm14, %v432_v47, 0.0  ;;  %v450_v23 = vadd.f32 %v449_v38, %v448_v7  ;;  %v434_v49 = vmul.f32 %v1033_v27, %v1033_v27  ;;  %v489_v7 = vld [vmem:[%s1115_s1] sm:$0xff] }
  0xfb   :  { %v442_v33 = vadd.f32 %v441_v45, %v440_v51  ;;  %v492_v45 = vld [vmem:[%s1114_s2 + $0x8] sm:$0x3] }
  0xfc   :  { %v445_v55 = vadd.f32 %v434_v49, %v433_v37 }
  0xfd   :  { %418 = vadd.xlane.f32.xlu2 %v417_v50 }
 0x101   :  { %451 = vadd.xlane.f32.xlu1 %v450_v23 }
 0x102   :  { %443 = vadd.xlane.f32.xlu0 %v442_v33 }
 0x105   :  { %438 = vadd.xlane.f32.xlu2 %v437_v61 }
 0x10a   :  { %446 = vadd.xlane.f32.xlu0 %v445_v55 }
 0x11e   :  { %523 = vperm.xlu0 %571, %v491_v43  }
 0x168   :  { %v410_v14 = vpop.xlane.xlu2 %409 }
 0x16c   :  { %v424_v28 = vpop.xlane.xlu1 %423 }
 0x16d   :  { %v416_v17 = vpop.xlane.xlu0 %415  ;;  %v427_v32 = vsel %vm411_vm14, %v424_v28, 0.0 }
 0x16e   :  { %v426_v52 = vsel %vm411_vm14, %v416_v17, 0.0 }
 0x16f   :  { %v428_v8 = vadd.f32 %v427_v32, %v426_v52 }
 0x170   :  { %v419_v18 = vpop.xlane.xlu2 %418 }
 0x171   :  { %v1059_v11 = vmul.f32 0.001953125, %v428_v8  ;;  %v425_v36 = vadd.f32 %v419_v18, %v410_v14 }
 0x173   :  { %v462_v30 = vmul.f32 %v1059_v11, %v1059_v11  ;;  %v457_v54 = vmul.f32 0.001953125, %v425_v36 }
 0x174   :  { %v452_v56 = vpop.xlane.xlu1 %451 }
 0x175   :  { %v455_v12 = vsel %vm411_vm14, %v452_v56, 0.0  ;;  %v444_v48 = vpop.xlane.xlu0 %443  ;;  %v461_v26 = vmul.f32 %v457_v54, %v457_v54  ;;  %v493_v23 = vsub.f32 %v1000_v15, %v457_v54  ;;  %v494_v10 = vsub.f32 %v1003_v57, %v457_v54 }
 0x176   :  { %v454_v29 = vsel %vm411_vm14, %v444_v48, 0.0  ;;  %v497_v58 = vsub.f32 %v1026_v20, %v457_v54  ;;  %v498_v33 = vsub.f32 %v1033_v27, %v457_v54  ;;  %v495_v15 = vsub.f32 %v1016_v1, %v1059_v11 }
 0x177   :  { %v456_v40 = vadd.f32 %v455_v12, %v454_v29  ;;  %v496_v57 = vsub.f32 %v1019_v39, %v1059_v11  ;;  %v499_v20 = vsub.f32 %v1010_v35, %v1059_v11  ;;  %v500_v27 = vsub.f32 %v1013_v2, %v1059_v11 }
 0x178   :  { %v439_v60 = vpop.xlane.xlu2 %438 }
 0x179   :  { %v460_v31 = vmul.f32 0.001953125, %v456_v40 }
 0x17b   :  { %v464_v53 = vsub.f32 %v460_v31, %v462_v30 }
 0x17d   :  { %v466_v21 = vmax.f32 %v464_v53, 0.0  ;;  %v447_v41 = vpop.xlane.xlu0 %446 }
 0x17e   :  { %v453_v16 = vadd.f32 %v447_v41, %v439_v60 }
 0x17f   :  { %v468_v42 = vadd.f32 1e-05, %v466_v21 }
 0x180   :  { %v459_v44 = vmul.f32 0.001953125, %v453_v16 }
 0x181   :  { %572 = vrsqrt.f32 %v468_v42  ;;  %vm485_vm0 = vweird.f32 %v468_v42 }
 0x182   :  { %v463_v34 = vsub.f32 %v459_v44, %v461_v26 }
 0x184   :  { %v465_v59 = vmax.f32 %v463_v34, 0.0 }
 0x186   :  { %v467_v9 = vadd.f32 1e-05, %v465_v59 }
 0x187   :  { %v573_v24 = vpop.eup %572 }
 0x188   :  { %v480_v13 = vmul.f32 %v573_v24, %v468_v42  ;;  %574 = vrsqrt.f32 %v467_v9  ;;  %vm486_vm15 = vweird.f32 %v573_v24  ;;  %vm475_vm3 = vweird.f32 %v467_v9 }
 0x189   :  { %vm487_vm1 = vmor %vm485_vm0, %vm486_vm15 }
 0x18a   :  { %v481_v25 = vmul.f32 %v573_v24, %v480_v13 }
 0x18c   :  { %v482_v19 = vmul.f32 0.5, %v481_v25 }
 0x18e   :  { %v575_v62 = vpop.eup %574  ;;  %v483_v63 = vsub.f32 1.5, %v482_v19 }
 0x18f   :  { %v470_v3 = vmul.f32 %v575_v62, %v467_v9  ;;  %vm476_vm2 = vweird.f32 %v575_v62 }
 0x190   :  { %v484_v6 = vmul.f32 %v573_v24, %v483_v63  ;;  %vm477_vm4 = vmor %vm475_vm3, %vm476_vm2  ;;  %v524_v37 = vpop.permute.xlu0 %523 }
 0x191   :  { %v471_v4 = vmul.f32 %v575_v62, %v470_v3 }
 0x192   :  { %v488_v22 = vsel %vm487_vm1, %v573_v24, %v484_v6 }
 0x193   :  { %v472_v46 = vmul.f32 0.5, %v471_v4  ;;  %v502_v0 = vmul.f32 %v490_v5, %v488_v22 }
 0x195   :  { %510 = vperm.xlu2 %570, %v502_v0   ;;  %v473_v47 = vsub.f32 1.5, %v472_v46 }
 0x197   :  { %v474_v50 = vmul.f32 %v575_v62, %v473_v47 }
 0x199   :  { %v478_v38 = vsel %vm477_vm4, %v575_v62, %v474_v50 }
 0x19a   :  { %v501_v51 = vmul.f32 %v489_v7, %v478_v38 }
 0x19c   :  { %505 = vperm.xlu1 %569, %v501_v51  }
 0x1a4   :  { %528 = vperm.xlu1 %569, %v492_v45  }
 0x1ef   :  { %v511_v8 = vpop.permute.xlu2 %510 }
 0x1f0   :  { %v515_v56 = vmul.f32 %v511_v8, %v495_v15  ;;  %v516_v12 = vmul.f32 %v511_v8, %v496_v57  ;;  %v519_v1 = vmul.f32 %v511_v8, %v499_v20  ;;  %v520_v39 = vmul.f32 %v511_v8, %v500_v27 }
 0x20e   :  { %v506_v61 = vpop.permute.xlu1 %505 }
 0x20f   :  { %v513_v49 = vmul.f32 %v506_v61, %v493_v23  ;;  %v514_v55 = vmul.f32 %v506_v61, %v494_v10  ;;  %v517_v14 = vmul.f32 %v506_v61, %v497_v58  ;;  %v518_v28 = vmul.f32 %v506_v61, %v498_v33 }
 0x211   :  { %v531_v17 = vadd.f32 %v524_v37, %v513_v49  ;;  %v532_v32 = vadd.f32 %v524_v37, %v514_v55  ;;  %v535_v52 = vadd.f32 %v524_v37, %v517_v14  ;;  %v536_v18 = vadd.f32 %v524_v37, %v518_v28 }
 0x213   :  { %539 = vst [vmem:[%s1116_s3] sm:$0xff] %v531_v17 }
 0x214   :  { %540 = vst [vmem:[%s1116_s3 + $0x8] sm:$0xff] %v532_v32 }
 0x215   :  { %543 = vst [vmem:[%s1116_s3 + $0x20] sm:$0xff] %v535_v52 }
 0x216   :  { %544 = vst [vmem:[%s1116_s3 + $0x28] sm:$0xff] %v536_v18  ;;  %v529_v35 = vpop.permute.xlu1 %528 }
 0x217   :  { %v533_v48 = vadd.f32 %v529_v35, %v515_v56  ;;  %v534_v29 = vadd.f32 %v529_v35, %v516_v12  ;;  %v537_v2 = vadd.f32 %v529_v35, %v519_v1  ;;  %v538_v11 = vadd.f32 %v529_v35, %v520_v39 }
 0x219   :  { %541 = vst [vmem:[%s1116_s3 + $0x10] sm:$0x3] %v533_v48 }
 0x21a   :  { %542 = vst [vmem:[%s1116_s3 + $0x18] sm:$0x3] %v534_v29 }
 0x21b   :  { %545 = vst [vmem:[%s1116_s3 + $0x30] sm:$0x3] %v537_v2 }
 0x21c   :  { %546 = vst [vmem:[%s1116_s3 + $0x38] sm:$0x3] %v538_v11 }

</bundles_post_ra>
